<compile_context>
chip_gen: v6e
topology: v6e:2x2x1
jax: 0.10.0
libtpu: 0.0.40
codegen_flags: <defaults>
</compile_context>

<pallas_src>
import math

import jax
import jax.numpy as jnp
from jax import lax
from jax.experimental import pallas as pl
from jax.experimental.pallas import tpu as pltpu


# ----------------------------------------------------------------------------
# Kernels: blocks are (nb, C, hw_tile); H*W is the lane (fast) dimension.
# ----------------------------------------------------------------------------

def _conv1x1_kernel(x_ref, w_ref, b_ref, o_ref):
    # x: (nb, c_in, t), w: (c_out, c_in), b: (c_out, 1), o: (nb, c_out, t)
    w = w_ref[...]
    b = b_ref[...].astype(jnp.float32)
    nb = x_ref.shape[0]

    def one(i):
        acc = jnp.dot(w, x_ref[i], preferred_element_type=jnp.float32)
        o_ref[i] = (acc + b).astype(o_ref.dtype)

    if nb <= 8:                      # small static batch-fold: unroll for LLO
        for i in range(nb):
            one(i)
    else:                            # large fold: bounded code size
        lax.fori_loop(0, nb, lambda i, c: (one(i), c)[1], 0)


def _pad_channels_kernel(x_ref, o_ref):
    # x: (nb, c_in, t), o: (nb, c_out, t), c_out > c_in.
    # Single full-width store per image (copy + zero tail), no partial vst.msk.
    nb, c_out, t = o_ref.shape
    c_in = x_ref.shape[1]
    zero_tail = jnp.zeros((c_out - c_in, t), dtype=o_ref.dtype)

    def one(i):
        o_ref[i] = jnp.concatenate(
            [x_ref[i].astype(o_ref.dtype), zero_tail], axis=0)

    if nb <= 8:
        for i in range(nb):
            one(i)
    else:
        lax.fori_loop(0, nb, lambda i, c: (one(i), c)[1], 0)


# ----------------------------------------------------------------------------
# Tiling helpers
# ----------------------------------------------------------------------------

# Per-grid-step streamed-bytes target (in + out).  6 MiB amortises the
# ~0.35us per-step overhead on the fastest HBM (v7x, ~3.2 TB/s) while the
# double-buffered footprint (~2x this) fits easily in every generation's VMEM.
_STEP_BYTES_TARGET = 6 << 20
_MAX_BATCH_FOLD = 1024


def _pick_tiles(n, hw, c_in, c_out, itemsize):
    """Pick (nb, hw_tile): batch images per block and lane tile along H*W."""
    per_lane = (c_in + c_out) * itemsize          # streamed bytes / lane / image
    want_lanes = max(128, _STEP_BYTES_TARGET // per_lane)
    if hw >= want_lanes:
        hw_tile = max(128, (want_lanes // 128) * 128)   # 128-multiple tile
        nb = 1
    else:
        hw_tile = hw                                    # full-extent (always legal)
        nb = int(max(1, min(n, want_lanes // hw, _MAX_BATCH_FOLD)))
    return nb, hw_tile


def _vmem_limit_bytes(nb, tile, c_in, c_out, itemsize):
    in_b = nb * c_in * tile * itemsize
    out_b = nb * c_out * tile * itemsize
    acc_b = c_out * tile * 4                      # f32 matmul intermediate
    need = 2 * (in_b + out_b) + acc_b + (2 << 20)  # double buffers + slack
    return int(min(48 << 20, max(32 << 20, need)))  # <= 48 MiB: safe on v7x


def _compiler_params(vmem_bytes):
    return pltpu.CompilerParams(
        dimension_semantics=("parallel", "parallel"),
        vmem_limit_bytes=vmem_bytes,
    )


# ----------------------------------------------------------------------------
# Module
# ----------------------------------------------------------------------------

class Align:
    """JAX/Pallas port of model.layers.Align (NCHW in / NCHW out)."""

    def __init__(self, c_in, c_out, key=None, dtype=jnp.float32,
                 weight=None, bias=None,
                 min_pallas_bytes=256 * 1024, tile_override=None):
        self.c_in = c_in
        self.c_out = c_out
        self.dtype = dtype
        self.min_pallas_bytes = min_pallas_bytes
        self._tile_override = tile_override       # (nb, hw_tile), tests only
        if c_in > c_out:
            if weight is not None:
                # Accept PyTorch (c_out, c_in, 1, 1) or (c_out, c_in).
                w = jnp.asarray(weight, dtype).reshape(c_out, c_in)
                b = jnp.asarray(bias, dtype).reshape(c_out)
                self.weight, self.bias = w, b
            else:
                # Synthetic init mimicking nn.Conv2d defaults (1x1 kernel):
                # uniform in [-1/sqrt(fan_in), 1/sqrt(fan_in)].
                if key is None:
                    key = jax.random.PRNGKey(42)
                kw, kb = jax.random.split(key)
                bound = 1.0 / math.sqrt(c_in)
                self.weight = jax.random.uniform(kw, (c_out, c_in), dtype,
                                                 -bound, bound)
                self.bias = jax.random.uniform(kb, (c_out,), dtype,
                                               -bound, bound)

    # ---- tile selection (with test override) ------------------------------
    def _tiles(self, n, hw, itemsize):
        if self._tile_override is not None:
            nb, tile = self._tile_override
            nb = max(1, min(int(nb), n))
            tile = min(int(tile), hw)
            if tile < hw:
                tile = max(128, (tile // 128) * 128)   # keep block legal
            return nb, tile
        return _pick_tiles(n, hw, self.c_in, self.c_out, itemsize)

    # ---- branch: c_in > c_out (1x1 conv) ----------------------------------
    def _conv_pallas(self, x):
        n, c, h, w_sp = x.shape
        hw = h * w_sp
        itemsize = jnp.dtype(x.dtype).itemsize
        nb, tile = self._tiles(n, hw, itemsize)

        x3 = x.reshape(n, c, hw)                   # free reshape, stays NCHW
        w2 = self.weight.astype(x.dtype)           # (c_out, c_in), grid-invariant
        b2 = self.bias.reshape(self.c_out, 1).astype(x.dtype)

        cost = pl.CostEstimate(
            flops=2 * n * hw * self.c_in * self.c_out,
            transcendentals=0,
            bytes_accessed=(n * hw * (self.c_in + self.c_out)
                            + self.c_in * self.c_out + self.c_out) * itemsize,
        )

        out3 = pl.pallas_call(
            _conv1x1_kernel,
            out_shape=jax.ShapeDtypeStruct((n, self.c_out, hw), x.dtype),
            grid_spec=pltpu.PrefetchScalarGridSpec(
                num_scalar_prefetch=0,
                grid=(pl.cdiv(n, nb), pl.cdiv(hw, tile)),
                in_specs=[
                    pl.BlockSpec((nb, self.c_in, tile), lambda i, j: (i, 0, j)),
                    pl.BlockSpec((self.c_out, self.c_in), lambda i, j: (0, 0)),
                    pl.BlockSpec((self.c_out, 1), lambda i, j: (0, 0)),
                ],
                out_specs=pl.BlockSpec((nb, self.c_out, tile),
                                       lambda i, j: (i, 0, j)),
            ),
            compiler_params=_compiler_params(
                _vmem_limit_bytes(nb, tile, self.c_in, self.c_out, itemsize)),
            cost_estimate=cost,
        )(x3, w2, b2)

        return out3.reshape(n, self.c_out, h, w_sp)

    def _conv_xla(self, x):
        y = jnp.einsum("oc,nchw->nohw",
                       self.weight.astype(jnp.float32), x.astype(jnp.float32),
                       precision=jax.lax.Precision.HIGHEST)
        y = y + self.bias.astype(jnp.float32)[None, :, None, None]
        return y.astype(x.dtype)

    # ---- branch: c_in < c_out (zero-pad channels) --------------------------
    def _pad_pallas(self, x):
        n, c, h, w_sp = x.shape
        hw = h * w_sp
        itemsize = jnp.dtype(x.dtype).itemsize
        nb, tile = self._tiles(n, hw, itemsize)

        x3 = x.reshape(n, c, hw)

        cost = pl.CostEstimate(
            flops=0,
            transcendentals=0,
            bytes_accessed=n * hw * (self.c_in + self.c_out) * itemsize,
        )

        out3 = pl.pallas_call(
            _pad_channels_kernel,
            out_shape=jax.ShapeDtypeStruct((n, self.c_out, hw), x.dtype),
            grid_spec=pltpu.PrefetchScalarGridSpec(
                num_scalar_prefetch=0,
                grid=(pl.cdiv(n, nb), pl.cdiv(hw, tile)),
                in_specs=[
                    pl.BlockSpec((nb, self.c_in, tile), lambda i, j: (i, 0, j)),
                ],
                out_specs=pl.BlockSpec((nb, self.c_out, tile),
                                       lambda i, j: (i, 0, j)),
            ),
            compiler_params=_compiler_params(
                _vmem_limit_bytes(nb, tile, self.c_in, self.c_out, itemsize)),
            cost_estimate=cost,
        )(x3)

        return out3.reshape(n, self.c_out, h, w_sp)

    def _pad_xla(self, x):
        return jnp.pad(x, ((0, 0), (0, self.c_out - self.c_in), (0, 0), (0, 0)))

    # ---- forward -----------------------------------------------------------
    def __call__(self, x):
        assert x.ndim == 4 and x.shape[1] == self.c_in, \
            "expected NCHW input with C == c_in"
        if self.c_in == self.c_out:
            return x                                    # identity, as in PyTorch
        nbytes = x.size * jnp.dtype(x.dtype).itemsize
        use_pallas = nbytes >= self.min_pallas_bytes
        if self.c_in > self.c_out:
            return self._conv_pallas(x) if use_pallas else self._conv_xla(x)
        return self._pad_pallas(x) if use_pallas else self._pad_xla(x)


if __name__ == "__main__":
    key = jax.random.PRNGKey(0)
    k1, k2, k3, k4, k5, k6 = jax.random.split(key, 6)

    def conv_ref(x, align):
        hi = jax.lax.Precision.HIGHEST
        return (jnp.einsum("oc,nchw->nohw", align.weight, x, precision=hi)
                + align.bias[None, :, None, None])

    # --- case 1: c_in > c_out, small shape, forced Pallas -------------------
    x_conv = jax.random.normal(k1, (2, 8, 16, 16), jnp.float32)      # NCHW
    align_conv = Align(c_in=8, c_out=4, min_pallas_bytes=0)
    y_conv = jax.block_until_ready(align_conv(x_conv))
    assert y_conv.shape == (2, 4, 16, 16)
    assert jnp.allclose(y_conv, conv_ref(x_conv, align_conv), atol=1e-3, rtol=1e-3)

    # --- case 2: c_in < c_out (channel zero-pad), forced Pallas -------------
    x_pad = jax.random.normal(k2, (2, 4, 16, 16), jnp.float32)       # NCHW
    align_pad = Align(c_in=4, c_out=8, min_pallas_bytes=0)
    y_pad = jax.block_until_ready(align_pad(x_pad))
    ref_pad = jnp.pad(x_pad, ((0, 0), (0, 4), (0, 0), (0, 0)))
    assert y_pad.shape == (2, 8, 16, 16)
    assert jnp.array_equal(y_pad, ref_pad)

    # --- case 3: c_in == c_out (identity) ------------------------------------
    x_id = jax.random.normal(k3, (2, 4, 16, 16), jnp.float32)
    align_id = Align(c_in=4, c_out=4)
    y_id = jax.block_until_ready(align_id(x_id))
    assert jnp.array_equal(y_id, x_id)

    # --- case 4: ragged trailing H*W block (hw=200 > tile=128, not 128-mult) -
    x_rag = jax.random.normal(k4, (1, 8, 10, 20), jnp.float32)       # H*W = 200
    align_rag = Align(c_in=8, c_out=4, min_pallas_bytes=0, tile_override=(1, 128))
    y_rag = jax.block_until_ready(align_rag(x_rag))
    assert y_rag.shape == (1, 4, 10, 20)
    assert jnp.allclose(y_rag, conv_ref(x_rag, align_rag), atol=1e-3, rtol=1e-3)

    # --- case 5: batch folding with a ragged batch block (n=3, nb=2) ---------
    x_bat = jax.random.normal(k5, (3, 8, 16, 16), jnp.float32)       # H*W = 256
    align_bat = Align(c_in=8, c_out=4, min_pallas_bytes=0, tile_override=(2, 256))
    y_bat = jax.block_until_ready(align_bat(x_bat))
    assert y_bat.shape == (3, 4, 16, 16)
    assert jnp.allclose(y_bat, conv_ref(x_bat, align_bat), atol=1e-3, rtol=1e-3)

    # --- case 6: default config, big enough for the Pallas path --------------
    x_big = jax.random.normal(k6, (2, 8, 64, 128), jnp.float32)      # 512 KiB
    align_def = Align(c_in=8, c_out=4)
    y_big = jax.block_until_ready(align_def(x_big))
    assert y_big.shape == (2, 4, 64, 128)
    assert jnp.allclose(y_big, conv_ref(x_big, align_def), atol=1e-3, rtol=1e-3)

    # --- case 7: default config, tiny input -> XLA fallback dispatch ---------
    y_tiny = jax.block_until_ready(align_def(x_conv))
    assert jnp.allclose(y_tiny, conv_ref(x_conv, align_def), atol=1e-3, rtol=1e-3)

    print("KERNEL_OK")
</pallas_src>

<mosaic_0001>
module attributes {stable_mosaic.version = 11 : i64} {
  func.func @_conv1x1_kernel(%arg0: i32, %arg1: i32, %arg2: memref<2x8x256xf32, #tpu.memory_space<vmem>>, %arg3: memref<4x8xf32, #tpu.memory_space<vmem>>, %arg4: memref<4x1xf32, #tpu.memory_space<vmem>>, %arg5: memref<2x4x256xf32, #tpu.memory_space<vmem>>) attributes {dimension_semantics = [#tpu.dimension_semantics<parallel>, #tpu.dimension_semantics<parallel>], iteration_bounds = array<i64: 1, 1>, scalar_prefetch = 0 : i64, scratch_operands = 0 : i64, tpu.core_type = #tpu.core_type<tc>, window_params = [{transform_indices = @transform_0, window_bounds = array<i64: 2, 8, 256>}, {pipeline_mode = #tpu.pipeline_mode<synchronous>, transform_indices = @transform_1, window_bounds = array<i64: 4, 8>}, {pipeline_mode = #tpu.pipeline_mode<synchronous>, transform_indices = @transform_2, window_bounds = array<i64: 4, 1>}, {transform_indices = @transform_3, window_bounds = array<i64: 2, 4, 256>}]} {
    %c0 = arith.constant 0 : index
    %c0_0 = arith.constant 0 : index
    %0 = vector.load %arg3[%c0, %c0_0] : memref<4x8xf32, #tpu.memory_space<vmem>>, vector<4x8xf32>
    %c0_1 = arith.constant 0 : index
    %c0_2 = arith.constant 0 : index
    %1 = vector.load %arg4[%c0_1, %c0_2] : memref<4x1xf32, #tpu.memory_space<vmem>>, vector<4x1xf32>
    %c0_3 = arith.constant 0 : index
    %c0_4 = arith.constant 0 : index
    %c0_5 = arith.constant 0 : index
    %2 = vector.load %arg2[%c0_3, %c0_4, %c0_5] : memref<2x8x256xf32, #tpu.memory_space<vmem>>, vector<1x8x256xf32>
    %3 = vector.shape_cast %2 : vector<1x8x256xf32> to vector<8x256xf32>
    %cst = arith.constant dense<0.000000e+00> : vector<4x256xf32>
    %4 = tpu.matmul %0, %3, %cst {dimension_numbers = #tpu.dot_dimension_numbers<[1], [0], [0], [1], [0, 0, 1, 1], [], []>} : vector<4x8xf32>, vector<8x256xf32>, vector<4x256xf32> -> vector<4x256xf32>
    %5 = vector.broadcast %1 : vector<4x1xf32> to vector<4x256xf32>
    %6 = arith.addf %4, %5 : vector<4x256xf32>
    %c0_6 = arith.constant 0 : index
    %c0_7 = arith.constant 0 : index
    %c0_8 = arith.constant 0 : index
    %7 = vector.load %arg5[%c0_6, %c0_7, %c0_8] : memref<2x4x256xf32, #tpu.memory_space<vmem>>, vector<1x4x256xf32>
    %8 = vector.shape_cast %7 : vector<1x4x256xf32> to vector<4x256xf32>
    %9 = vector.shape_cast %6 : vector<4x256xf32> to vector<1x4x256xf32>
    tpu.vector_store %arg5[%c0_6, %c0_7, %c0_8], %9 {strides = array<i32>} : memref<2x4x256xf32, #tpu.memory_space<vmem>>, vector<1x4x256xf32>,
    %c1 = arith.constant 1 : index
    %c0_9 = arith.constant 0 : index
    %c0_10 = arith.constant 0 : index
    %10 = vector.load %arg2[%c1, %c0_9, %c0_10] : memref<2x8x256xf32, #tpu.memory_space<vmem>>, vector<1x8x256xf32>
    %11 = vector.shape_cast %10 : vector<1x8x256xf32> to vector<8x256xf32>
    %cst_11 = arith.constant dense<0.000000e+00> : vector<4x256xf32>
    %12 = tpu.matmul %0, %11, %cst_11 {dimension_numbers = #tpu.dot_dimension_numbers<[1], [0], [0], [1], [0, 0, 1, 1], [], []>} : vector<4x8xf32>, vector<8x256xf32>, vector<4x256xf32> -> vector<4x256xf32>
    %13 = vector.broadcast %1 : vector<4x1xf32> to vector<4x256xf32>
    %14 = arith.addf %12, %13 : vector<4x256xf32>
    %c1_12 = arith.constant 1 : index
    %c0_13 = arith.constant 0 : index
    %c0_14 = arith.constant 0 : index
    %15 = vector.load %arg5[%c1_12, %c0_13, %c0_14] : memref<2x4x256xf32, #tpu.memory_space<vmem>>, vector<1x4x256xf32>
    %16 = vector.shape_cast %15 : vector<1x4x256xf32> to vector<4x256xf32>
    %17 = vector.shape_cast %14 : vector<4x256xf32> to vector<1x4x256xf32>
    tpu.vector_store %arg5[%c1_12, %c0_13, %c0_14], %17 {strides = array<i32>} : memref<2x4x256xf32, #tpu.memory_space<vmem>>, vector<1x4x256xf32>,
    return
  }
  func.func @transform_0(%arg0: i32, %arg1: i32) -> (i32, i32, i32) {
    %c0_i32 = arith.constant 0 : i32
    %c0_i32_0 = arith.constant 0 : i32
    return %arg0, %c0_i32, %arg1 : i32, i32, i32
  }
  func.func @transform_1(%arg0: i32, %arg1: i32) -> (i32, i32) {
    %c0_i32 = arith.constant 0 : i32
    %c0_i32_0 = arith.constant 0 : i32
    %c0_i32_1 = arith.constant 0 : i32
    return %c0_i32, %c0_i32_0 : i32, i32
  }
  func.func @transform_2(%arg0: i32, %arg1: i32) -> (i32, i32) {
    %c0_i32 = arith.constant 0 : i32
    %c0_i32_0 = arith.constant 0 : i32
    %c0_i32_1 = arith.constant 0 : i32
    return %c0_i32, %c0_i32_0 : i32, i32
  }
  func.func @transform_3(%arg0: i32, %arg1: i32) -> (i32, i32, i32) {
    %c0_i32 = arith.constant 0 : i32
    %c0_i32_0 = arith.constant 0 : i32
    return %arg0, %c0_i32, %arg1 : i32, i32, i32
  }
}

</mosaic_0001>

<bundles_post_ra>
// kernel: tpu_custom_call.1
= control target key start
LH: loop header
LB: loop body
LE: loop exit
PB: predicated region body
PF: predicated region fallthrough
CT: control target
= control target key end

     0   :  { %8 = vsyncpa [#allocation3], 0  ;;  %s310_s0 = inlined_call_operand.hbm [shape: f32[2,8,256], index: 0, kind: input, shape index: {}]   ;;  %s311_s1 = inlined_call_operand.vmem [shape: f32[4,8], index: 1, kind: input, shape index: {}]   ;;  %s312_s2 = inlined_call_operand.vmem [shape: f32[4,1], index: 2, kind: input, shape index: {}]   ;;  %s313_s3 = inlined_call_operand.hbm [shape: f32[2,4,256], index: 3, kind: output, shape index: {}]  }
   0x1   :  { %9 = vsyncpa [#allocation4], 0  ;;  %s270_s12 = smov [#allocation2]  }
   0x2   :  { %s15_s13 = sshll.u32 %s270_s12, 4  ;;  %s16_s13 = int_to_ptr.vmem [resolvable:$true] %s15_s13 }
   0x3   :  { %s234_s14 = scalar_lea.vmem %s16_s13, 512  ;;  %p239_p1 = scmp.lt.s32.totalorder %s16_s13, %s16_s13 }
   0x4   :  { %p235_p0 = scmp.ne.s32.totalorder %s16_s13, %s234_s14  ;;  %p240_p2 = scmp.lt.s32.totalorder %s234_s14, %s234_s14 }
   0x6   :  { %p241_p3 = por %p240_p2, %p239_p1 }
   0x8   :  { %p242_p4 = pnand %p241_p3, %p235_p0 }
   0xa   :  { %245 = shalt.err (!%p242_p4)
}
   0xb   :  { %s271_s15 = smov 256   ;;  %s272_s16 = smov 16  }
   0xc   :  { %21 = dma.hbm_to_vmem [thread:$0]  %s310_s0, 512, %s16_s13, [#allocation3], %s271_s15, %s271_s15, %s272_s16  }
   0xd   :  { %266 = dma.done.wait [#allocation3], 512  }
   0xe   :  { %267 = vsyncadd [#allocation3], 4294966784  ;;  %v273_v0 = vmov 0.0   ;;  %v274_v1 = vmov 0   ;;  %v32_v2 = vld [vmem:[#allocation2 + $0x8] sm:$0xff]  ;;  %v120_v3 = vld [vmem:[#allocation2 + $0x18] sm:$0xff] }
   0xf   :  { %106 = vmatprep.mubr.f32.mxu0 %v273_v0  ;;  %185 = vmatprep.mubr.f32.mxu1 %v273_v0  ;;  %v31_v4 = vld [vmem:[#allocation2] sm:$0xff]  ;;  %vm38_vm0 = vcmask 64512   ;;  %v119_v5 = vld [vmem:[#allocation2 + $0x10] sm:$0xff]  ;;  %s275_s22 = smov [#allocation5]  }
  0x10   :  { %225 = vset.pattern.permute.xlu0 %v274_v1  ;;  %72 = vmatprep.subr.mxu0 %v32_v2  ;;  %v29_v6 = vld [vmem:[%s311_s1] sm:$0xf]  ;;  %s203_s23 = sshll.u32 %s275_s22, 4  ;;  %s204_s23 = int_to_ptr.vmem [resolvable:$true] %s203_s23 }
  0x11   :  { %151 = vmatprep.subr.mxu1 %v120_v3  ;;  %v30_v7 = vld [vmem:[%s312_s2] sm:$0xf]  ;;  %73 = vmatpush1.msra.mxu0 %v31_v4  ;;  %s246_s1 = scalar_lea.vmem %s204_s23, 256  ;;  %p251_p6 = scmp.lt.s32.totalorder %s204_s23, %s204_s23 }
  0x12   :  { %152 = vmatpush1.msra.mxu1 %v119_v5  ;;  %215 = vmatmul.mubr.msk.f32.vlgmr.msra.gmra.mxu0 %vm38_vm0, %v29_v6  ;;  %p247_p5 = scmp.ne.s32.totalorder %s204_s23, %s246_s1  ;;  %p252_p7 = scmp.lt.s32.totalorder %s246_s1, %s246_s1 }
  0x13   :  { %216 = vmatmul.mubr.msk.f32.vlgmr.msra.gmra.mxu1 %vm38_vm0, %v29_v6  ;;  %35 = vperm.xlu0 %225, %v30_v7  }
  0x14   :  { %p253_p8 = por %p252_p7, %p251_p6 }
  0x16   :  { %p254_p9 = pnand %p253_p8, %p247_p5 }
  0x8e   :  { %v36_v8 = vpop.permute.xlu0 %35 }
  0xd2   :  { %v108_v9 = vpop.f32.mrf.mxu0 }
  0xd3   :  { %v187_v10 = vpop.f32.mrf.mxu1  ;;  %v109_v13 = vadd.f32 %v108_v9, %v36_v8 }
  0xd4   :  { %v110_v11 = vpop.f32.mrf.mxu0  ;;  %v188_v14 = vadd.f32 %v187_v10, %v36_v8 }
  0xd5   :  { %v189_v12 = vpop.f32.mrf.mxu1  ;;  %v111_v15 = vadd.f32 %v110_v11, %v36_v8 }
  0xd6   :  { %v190_v16 = vadd.f32 %v189_v12, %v36_v8 }
  0xd7   :  { %v115_v17 = vcombine.low %v109_v13, %v111_v15 }
  0xd8   :  { %v194_v18 = vcombine.low %v188_v14, %v190_v16 }
  0xd9   :  { %117 = vst [vmem:[#allocation5] sm:$0xff] %v115_v17 }
  0xda   :  { %197 = vst [vmem:[#allocation5 + $0x8] sm:$0xff] %v194_v18 }
  0xdb   :  { %257 = shalt.err (!%p254_p9)
}
  0xdc   :  { %s276_s2 = smov 128   ;;  %s277_s24 = smov 8  }
  0xdd   :  { %209 = dma.vmem_to_hbm [thread:$0]  %s204_s23, 256, %s313_s3, [#allocation4], %s276_s2, %s276_s2, %s277_s24  }
  0xde   :  { %268 = dma.done.wait [#allocation4], 256  }
  0xdf   :  { %269 = vsyncadd [#allocation4], 4294967040 }
  0xe0   :  { %213 = vsyncpa [#allocation3], 1 }
  0xe1   :  { %214 = vsyncpa [#allocation4], 1 }

</bundles_post_ra>
